<compile_context>
chip_gen: v7x
topology: tpu7x:2x2x1
jax: 0.10.0
libtpu: 0.0.40
codegen_flags: <defaults>
</compile_context>

<pallas_src>
import math
from functools import partial

import jax
import jax.numpy as jnp
from jax import lax
from jax.experimental import pallas as pl
from jax.experimental.pallas import tpu as pltpu


def mapping_kernel(z_ref, w_ref, b_ref, o_ref, x_scratch, *, w_gain, b_gain):
    # z_ref: [tb, z_dim]             (VMEM, same block revisited every layer)
    # w_ref: [1, w_dim, in_features] (VMEM, raw weights for layer l)
    # b_ref: [1, 1, w_dim]           (VMEM, raw bias for layer l)
    # o_ref: [tb, w_dim]             (VMEM, written once on the last layer)
    # x_scratch: [tb, w_dim] f32     (carried activation)
    l = pl.program_id(1)

    @pl.when(l == 0)
    def _():
        z = z_ref[...].astype(jnp.float32)
        ms = jnp.mean(z * z, axis=1, keepdims=True)   # normalize_2nd_moment
        x_scratch[...] = z * lax.rsqrt(ms + 1e-8)

    x = x_scratch[...]                                # [tb, K] f32
    w_l = w_ref[0]                                    # [N, K] (PyTorch Linear layout)
    # Contract over K without an explicit transpose (pure MXU push).
    y = lax.dot_general(
        x, w_l, (((1,), (1,)), ((), ())), preferred_element_type=jnp.float32
    )
    # Fold the runtime equalized-lr gains here (scalar VPU ops, hidden under MXU).
    y = y * jnp.float32(w_gain) + b_ref[0] * jnp.float32(b_gain)
    # bias_act 'lrelu': leaky_relu(., 0.2) followed by gain sqrt(2)
    x_scratch[...] = jnp.where(y >= 0, y, 0.2 * y) * jnp.float32(math.sqrt(2.0))

    @pl.when(l == pl.num_programs(1) - 1)
    def _():
        o_ref[...] = x_scratch[...].astype(o_ref.dtype)


def mapping_network(z, weights, biases, *, num_ws, lr_multiplier=0.01, batch_tile=None):
    """z: [B, z_dim]; weights: [L, w_dim, in_features] (raw); biases: [L, w_dim] (raw)."""
    B, z_dim = z.shape
    L, w_dim, in_features = weights.shape
    assert in_features == z_dim == w_dim, "this kernel assumes z_dim == w_dim"

    if batch_tile is None:
        batch_tile = B if B <= 256 else 256
    assert B % batch_tile == 0, "B must be divisible by the batch tile"
    tb = batch_tile

    # Runtime gains of FullyConnectedLayer — folded inside the kernel.
    w_gain = lr_multiplier / math.sqrt(in_features)
    b_gain = lr_multiplier

    # [L, w_dim] -> [L, 1, w_dim]: gives each layer's bias a layout-legal
    # (1, w_dim) tile and avoids an in-kernel broadcast_in_dim per layer.
    biases3 = biases.reshape(L, 1, w_dim).astype(jnp.float32)
    weights = weights.astype(jnp.float32)
    # TODO(synk): on v6e/v7x, casting weights (and the MXU LHS) to bf16 halves
    # weight DMA and doubles MXU throughput; kept f32 here for tight tolerances.

    kernel = partial(mapping_kernel, w_gain=w_gain, b_gain=b_gain)
    w_flat = pl.pallas_call(
        kernel,
        out_shape=jax.ShapeDtypeStruct((B, w_dim), jnp.float32),
        grid=(B // tb, L),
        in_specs=[
            pl.BlockSpec((tb, z_dim), lambda b, l: (b, 0)),
            pl.BlockSpec((1, w_dim, in_features), lambda b, l: (l, 0, 0)),
            pl.BlockSpec((1, 1, w_dim), lambda b, l: (l, 0, 0)),
        ],
        out_specs=pl.BlockSpec((tb, w_dim), lambda b, l: (b, 0)),
        scratch_shapes=[pltpu.VMEM((tb, w_dim), jnp.float32)],
        compiler_params=pltpu.CompilerParams(
            dimension_semantics=("parallel", "arbitrary")
        ),
    )(z, weights, biases3)

    # x.unsqueeze(1).repeat([1, num_ws, 1]) — done lazily outside the kernel so the
    # kernel never writes num_ws duplicated copies to HBM.
    return jnp.broadcast_to(w_flat[:, None, :], (B, num_ws, w_dim))


def mapping_network_ref(z, weights, biases, *, num_ws, lr_multiplier=0.01):
    """Pure-JAX reference matching the PyTorch module (eval, psi=1)."""
    x = z * lax.rsqrt(jnp.mean(z * z, axis=1, keepdims=True) + 1e-8)
    L, _, in_features = weights.shape
    w_gain = lr_multiplier / math.sqrt(in_features)
    for l in range(L):
        y = x @ (weights[l] * w_gain).T + biases[l] * lr_multiplier
        x = jnp.where(y >= 0, y, 0.2 * y) * math.sqrt(2.0)
    return jnp.broadcast_to(x[:, None, :], (x.shape[0], num_ws, x.shape[1]))


if __name__ == "__main__":
    # Small shapes consistent with the module: z_dim = w_dim (all layers square).
    B, z_dim, w_dim, num_layers, num_ws = 8, 32, 32, 8, 4
    lr_multiplier = 0.01

    key = jax.random.PRNGKey(0)
    kz, kw = jax.random.split(key)
    z = jax.random.normal(kz, (B, z_dim), dtype=jnp.float32)

    # Deterministic init mirroring FullyConnectedLayer.__init__:
    #   weight = randn([out, in]) / lr_multiplier ; bias = zeros([out])
    weights = (
        jax.random.normal(kw, (num_layers, w_dim, z_dim), dtype=jnp.float32)
        / lr_multiplier
    )
    biases = jnp.zeros((num_layers, w_dim), dtype=jnp.float32)

    out = mapping_network(z, weights, biases, num_ws=num_ws, lr_multiplier=lr_multiplier)
    out = jax.block_until_ready(out)

    ref = mapping_network_ref(z, weights, biases, num_ws=num_ws, lr_multiplier=lr_multiplier)
    assert out.shape == (B, num_ws, w_dim)
    assert jnp.allclose(out, ref, atol=1e-4, rtol=1e-4), "mismatch vs reference"

    print("KERNEL_OK")
</pallas_src>

<mosaic_0001>
module attributes {stable_mosaic.version = 11 : i64} {
  func.func @mapping_kernel(%arg0: i32, %arg1: i32, %arg2: memref<8x32xf32, #tpu.memory_space<vmem>>, %arg3: memref<1x32x32xf32, #tpu.memory_space<vmem>>, %arg4: memref<1x1x32xf32, #tpu.memory_space<vmem>>, %arg5: memref<8x32xf32, #tpu.memory_space<vmem>>, %arg6: memref<8x32xf32, #tpu.memory_space<vmem>>) attributes {dimension_semantics = [#tpu.dimension_semantics<parallel>, #tpu.dimension_semantics<arbitrary>], iteration_bounds = array<i64: 1, 8>, scalar_prefetch = 0 : i64, scratch_operands = 1 : i64, tpu.core_type = #tpu.core_type<tc>, window_params = [{transform_indices = @transform_0, window_bounds = array<i64: 8, 32>}, {transform_indices = @transform_1, window_bounds = array<i64: 1, 32, 32>}, {transform_indices = @transform_2, window_bounds = array<i64: 1, 1, 32>}, {transform_indices = @transform_3, window_bounds = array<i64: 8, 32>}]} {
    %c0_i32 = arith.constant 0 : i32
    %0 = arith.cmpi eq, %arg1, %c0_i32 : i32
    %1 = arith.extui %0 : i1 to i32
    %c0_i32_0 = arith.constant 0 : i32
    %2 = arith.cmpi ne, %1, %c0_i32_0 : i32
    scf.if %2 {
      %c0_16 = arith.constant 0 : index
      %c0_17 = arith.constant 0 : index
      %26 = vector.load %arg2[%c0_16, %c0_17] : memref<8x32xf32, #tpu.memory_space<vmem>>, vector<8x32xf32>
      %27 = arith.mulf %26, %26 : vector<8x32xf32>
      %cst_18 = arith.constant dense<0.000000e+00> : vector<8xf32>
      %28 = vector.multi_reduction <add>, %27, %cst_18 [1] : vector<8x32xf32> to vector<8xf32>
      %29 = vector.shape_cast %28 : vector<8xf32> to vector<8x1xf32>
      %cst_19 = arith.constant 3.200000e+01 : f32
      %30 = vector.broadcast %cst_19 : f32 to vector<8x1xf32>
      %31 = arith.divf %29, %30 : vector<8x1xf32>
      %cst_20 = arith.constant 9.99999993E-9 : f32
      %32 = vector.broadcast %cst_20 : f32 to vector<8x1xf32>
      %33 = arith.addf %31, %32 : vector<8x1xf32>
      %34 = math.rsqrt %33 : vector<8x1xf32>
      %35 = vector.broadcast %34 : vector<8x1xf32> to vector<8x32xf32>
      %36 = arith.mulf %26, %35 : vector<8x32xf32>
      %c0_21 = arith.constant 0 : index
      %c0_22 = arith.constant 0 : index
      %37 = vector.load %arg6[%c0_21, %c0_22] : memref<8x32xf32, #tpu.memory_space<vmem>>, vector<8x32xf32>
      tpu.vector_store %arg6[%c0_21, %c0_22], %36 {strides = array<i32>} : memref<8x32xf32, #tpu.memory_space<vmem>>, vector<8x32xf32>,
    } else {
    }
    %c0 = arith.constant 0 : index
    %c0_1 = arith.constant 0 : index
    %3 = vector.load %arg6[%c0, %c0_1] : memref<8x32xf32, #tpu.memory_space<vmem>>, vector<8x32xf32>
    %c0_2 = arith.constant 0 : index
    %c0_3 = arith.constant 0 : index
    %c0_4 = arith.constant 0 : index
    %4 = vector.load %arg3[%c0_2, %c0_3, %c0_4] : memref<1x32x32xf32, #tpu.memory_space<vmem>>, vector<1x32x32xf32>
    %5 = vector.shape_cast %4 : vector<1x32x32xf32> to vector<32x32xf32>
    %cst = arith.constant dense<0.000000e+00> : vector<8x32xf32>
    %6 = tpu.matmul %3, %5, %cst {dimension_numbers = #tpu.dot_dimension_numbers<[1], [1], [0], [0], [0, 0, 1, 0], [], []>} : vector<8x32xf32>, vector<32x32xf32>, vector<8x32xf32> -> vector<8x32xf32>
    %cst_5 = arith.constant 0.00176776689 : f32
    %7 = vector.broadcast %cst_5 : f32 to vector<8x32xf32>
    %8 = arith.mulf %6, %7 : vector<8x32xf32>
    %c0_6 = arith.constant 0 : index
    %c0_7 = arith.constant 0 : index
    %c0_8 = arith.constant 0 : index
    %9 = vector.load %arg4[%c0_6, %c0_7, %c0_8] : memref<1x1x32xf32, #tpu.memory_space<vmem>>, vector<1x1x32xf32>
    %10 = vector.shape_cast %9 : vector<1x1x32xf32> to vector<1x32xf32>
    %cst_9 = arith.constant 0.00999999977 : f32
    %11 = vector.broadcast %cst_9 : f32 to vector<1x32xf32>
    %12 = arith.mulf %10, %11 : vector<1x32xf32>
    %13 = vector.broadcast %12 : vector<1x32xf32> to vector<8x32xf32>
    %14 = arith.addf %8, %13 : vector<8x32xf32>
    %cst_10 = arith.constant 0.000000e+00 : f32
    %15 = vector.broadcast %cst_10 : f32 to vector<8x32xf32>
    %16 = arith.cmpf oge, %14, %15 : vector<8x32xf32>
    %cst_11 = arith.constant 2.000000e-01 : f32
    %17 = vector.broadcast %cst_11 : f32 to vector<8x32xf32>
    %18 = arith.mulf %17, %14 : vector<8x32xf32>
    %19 = arith.select %16, %14, %18 : vector<8x32xi1>, vector<8x32xf32>
    %cst_12 = arith.constant 1.41421354 : f32
    %20 = vector.broadcast %cst_12 : f32 to vector<8x32xf32>
    %21 = arith.mulf %19, %20 : vector<8x32xf32>
    %c0_13 = arith.constant 0 : index
    %c0_14 = arith.constant 0 : index
    %22 = vector.load %arg6[%c0_13, %c0_14] : memref<8x32xf32, #tpu.memory_space<vmem>>, vector<8x32xf32>
    tpu.vector_store %arg6[%c0_13, %c0_14], %21 {strides = array<i32>} : memref<8x32xf32, #tpu.memory_space<vmem>>, vector<8x32xf32>,
    %c7_i32 = arith.constant 7 : i32
    %23 = arith.cmpi eq, %arg1, %c7_i32 : i32
    %24 = arith.extui %23 : i1 to i32
    %c0_i32_15 = arith.constant 0 : i32
    %25 = arith.cmpi ne, %24, %c0_i32_15 : i32
    scf.if %25 {
      %c0_16 = arith.constant 0 : index
      %c0_17 = arith.constant 0 : index
      %26 = vector.load %arg6[%c0_16, %c0_17] : memref<8x32xf32, #tpu.memory_space<vmem>>, vector<8x32xf32>
      %c0_18 = arith.constant 0 : index
      %c0_19 = arith.constant 0 : index
      %27 = vector.load %arg5[%c0_18, %c0_19] : memref<8x32xf32, #tpu.memory_space<vmem>>, vector<8x32xf32>
      tpu.vector_store %arg5[%c0_18, %c0_19], %26 {strides = array<i32>} : memref<8x32xf32, #tpu.memory_space<vmem>>, vector<8x32xf32>,
    } else {
    }
    return
  }
  func.func @transform_0(%arg0: i32, %arg1: i32) -> (i32, i32) {
    %c0_i32 = arith.constant 0 : i32
    %c0_i32_0 = arith.constant 0 : i32
    return %arg0, %c0_i32 : i32, i32
  }
  func.func @transform_1(%arg0: i32, %arg1: i32) -> (i32, i32, i32) {
    %c0_i32 = arith.constant 0 : i32
    %c0_i32_0 = arith.constant 0 : i32
    %c0_i32_1 = arith.constant 0 : i32
    return %arg1, %c0_i32, %c0_i32_0 : i32, i32, i32
  }
  func.func @transform_2(%arg0: i32, %arg1: i32) -> (i32, i32, i32) {
    %c0_i32 = arith.constant 0 : i32
    %c0_i32_0 = arith.constant 0 : i32
    %c0_i32_1 = arith.constant 0 : i32
    return %arg1, %c0_i32, %c0_i32_0 : i32, i32, i32
  }
  func.func @transform_3(%arg0: i32, %arg1: i32) -> (i32, i32) {
    %c0_i32 = arith.constant 0 : i32
    %c0_i32_0 = arith.constant 0 : i32
    return %arg0, %c0_i32 : i32, i32
  }
}

</mosaic_0001>

<bundles_post_ra>
// kernel: tpu_custom_call.1
= control target key start
LH: loop header
LB: loop body
LE: loop exit
PB: predicated region body
PF: predicated region fallthrough
CT: control target
= control target key end

     0   :  { %8 = vsyncpa [#allocation4], 0  ;;  %s1041_s0 = inlined_call_operand.hbm [shape: f32[8,32], index: 0, kind: input, shape index: {}]   ;;  %s1042_s1 = inlined_call_operand.hbm [shape: f32[8,32,32], index: 1, kind: input, shape index: {}]   ;;  %s1043_s2 = inlined_call_operand.hbm [shape: f32[8,1,32], index: 2, kind: input, shape index: {}]   ;;  %s1044_s3 = inlined_call_operand.hbm [shape: f32[8,32], index: 3, kind: output, shape index: {}]  }
   0x1   :  { %9 = vsyncpa [#allocation7], 0 }
   0x2   :  { %11 = vsyncpa [#allocation7 + $0x1], 0 }
   0x3   :  { %12 = vsyncpa [#allocation5], 0  ;;  %s809_s12 = smov 0   ;;  %s811_s13 = smov 0  }
   0x4   :  { %s813_s14 = smov 0   ;;  %s815_s15 = smov 0  }
   0x5   :  { %s817_s16 = smov 0   ;;  %s819_s17 = smov 0  }
   0x6 LB: > { %s27_s18 = sadd.s32 1, %s774_s16  ;;  %s63_s19 = sadd.s32 1, %s766_s14  ;;  %s778_s17 = sphi %s819_s17, %s18_s17   ;;  %s774_s16 = sphi %s817_s16, %s1066_s16   ;;  %s770_s15 = sphi %s815_s15, %s1065_s15   ;;  %s766_s14 = sphi %s813_s14, %s1064_s14   ;;  %s762_s13 = sphi %s811_s13, %s1063_s13   ;;  %s758_s12 = sphi %s809_s12, %s1062_s12  }
   0x7   : > { %p28_p0 = scmp.ge.s32.totalorder %s27_s18, 8  ;;  %p70_p1 = scmp.ne.s32.totalorder %s766_s14, %s762_s13 }
   0x8   : > { %p71_p2 = scmp.eq.s32.totalorder %s778_s17, 0  ;;  %p545_p4 = scmp.lt.s32.totalorder %s778_s17, 8 }
   0x9   : > { %s1068_s18 = smov (%p28_p0, %s27_s18), 0  ;;  %s165_s21 = sand.u32 1, %s778_s17  }
   0xa   : > { %p72_p3 = por %p71_p2, %p70_p1  ;;  %s60_s20 = ssub.s32 %s774_s16, %s1068_s18 }
   0xb   : > { %p61_p5 = scmp.eq.s32.totalorder %s60_s20, 0  ;;  %s167_s22 = sand.u32 1, %s766_s14  }
   0xc   : > { %s496_s23 = sshll.u32 %s774_s16, 9  ;;  %s478_s25 = sshll.u32 %s167_s22, 5 }
   0xd   : > { %s853_s24 = scalar_select %p61_p5, %s766_s14, %s63_s19  }
   0xe   : > { %s860_s28 = scalar_lea.hbm %s1042_s1, %s496_s23  ;;  %p862_p6 = pnand %p545_p4, %p72_p3 }
   0xf   : > { %s169_s30 = scalar_lea.vmem [#allocation6], %s478_s25  ;;  %s868_s5 = scalar_lea.sflag [#allocation7], %s165_s21 }
  0x10   : > { %s1051_s29 = scalar_select %p862_p6, 1, 0 }
  0x11   : > { %s176_s4 = sshll.u32 %s169_s30, 4  ;;  %s606_s6 = scalar_lea.hbm %s860_s28, 512  ;;  %s866_s4 = int_to_ptr.vmem [resolvable:$true] %s176_s4 }
  0x12   : > { %p607_p7 = scmp.ne.s32.totalorder %s860_s28, %s606_s6  ;;  %p1046_p8 = pneg %p862_p6 }
  0x13   : > { %s611_s9 = scalar_lea.hbm %s1042_s1, 4096  ;;  %p612_p11 = scmp.lt.u32.totalorder %s860_s28, %s1042_s1 }
  0x14   : > { %p609_p9 = pnand %p1046_p8, %p607_p7  ;;  %p613_p12 = scmp.lt.u32.totalorder %s611_s9, %s606_s6 }
  0x15   : > { %p615_p0 = scmp.lt.u32.totalorder %s606_s6, %s860_s28 }
  0x16   : > { %p610_p10 = pneg %p609_p9  ;;  %p614_p13 = por %p613_p12, %p612_p11 }
  0x18   : > { %p616_p1 = por %p615_p0, %p614_p13 }
  0x1a   : > { %p617_p2 = pnand %p616_p1, %p610_p10 }
  0x1c   : > { %620 = shalt.err (!%p617_p2)
}
  0x1d   : > { %s621_s19 = scalar_lea.vmem %s866_s4, 512  ;;  %s780_s20 = smov [#allocation6]  }
  0x1e   : > { %p622_p3 = scmp.ne.s32.totalorder %s866_s4, %s621_s19  ;;  %s626_s21 = sshll.u32 %s780_s20, 4  ;;  %s627_s21 = int_to_ptr.vmem [resolvable:$false] %s626_s21 }
  0x1f   : > { %s628_s23 = scalar_lea.vmem %s627_s21, 1024  ;;  %p629_p7 = scmp.lt.s32.totalorder %s866_s4, %s627_s21 }
  0x20   : > { %p624_p4 = pnand %p622_p3, %p1046_p8  ;;  %p630_p9 = scmp.lt.s32.totalorder %s628_s23, %s621_s19 }
  0x22   : > { %p625_p5 = pneg %p624_p4  ;;  %p631_p11 = por %p630_p9, %p629_p7 }
  0x24   : > { %p632_p12 = pnand %p631_p11, %p625_p5 }
  0x26   : > { %635 = shalt.err (!%p632_p12)
}
  0x27   : > { %s781_s25 = smov 128   ;;  %s782_s26 = smov 8  }
  0x28   : > { %540 = dma.hbm_to_vmem [thread:$0]  (!%p862_p6), %s860_s28, 512, %s866_s4, %s868_s5, %s781_s25, %s781_s25, %s782_s26  }
  0x29   : > { %s897_s27 = sadd.s32 4294967295, %s778_s17   ;;  %p76_p10 = scmp.ne.s32.totalorder %s762_s13, %s758_s12 }
  0x2a   : > { %p1045_p13 = scmp.eq.s32.totalorder %s897_s27, 0  ;;  %p475_p0 = scmp.ge.s32.totalorder %s778_s17, 1 }
  0x2b   : > { %p139_p1 = scmp.lt.s32.totalorder %s778_s17, 9  ;;  %s783_s28 = smov [#allocation3]  }
  0x2c   : > { %p906_p2 = por %p1045_p13, %p76_p10  ;;  %s154_s4 = sshll.u32 %s783_s28, 4  ;;  %s155_s4 = int_to_ptr.vmem [resolvable:$true] %s154_s4 }
  0x2d   : > { %p910_p3 = pnand %p475_p0, %p139_p1  ;;  %s481_s7 = sshll.u32 %s774_s16, 4 }
  0x2e   : > { %s1052_s30 = scalar_select %p906_p2, 1, 0 }
  0x2f   : > { %s1053_s6 = scalar_select %p910_p3, 1, 0 }
  0x30   : > { %p533_p4 = pneg %p910_p3  ;;  %s189_s12 = scalar_lea.vmem [#allocation8], %s167_s22 }
  0x31   : > { %s196_s8 = sshll.u32 %s189_s12, 4  ;;  %s928_s19 = scalar_lea.hbm %s1043_s2, %s481_s7  ;;  %s930_s8 = int_to_ptr.vmem [resolvable:$true] %s196_s8 }
  0x32   : > { %p921_p5 = pnand %p533_p4, %p1045_p13  ;;  %s636_s23 = scalar_lea.hbm %s1041_s0, 128 }
  0x33   : > { %p637_p7 = scmp.ne.s32.totalorder %s1041_s0, %s636_s23  ;;  %p643_p10 = scmp.lt.u32.totalorder %s636_s23, %s1041_s0 }
  0x34   : > { %p638_p9 = pneg %p921_p5 }
  0x36   : > { %p639_p11 = pnand %p638_p9, %p637_p7 }
  0x38   : > { %p640_p12 = pneg %p639_p11 }
  0x3a   : > { %p645_p0 = pnand %p643_p10, %p640_p12 }
  0x3c   : > { %648 = shalt.err (!%p645_p0)
}
  0x3d   : > { %s649_s7 = scalar_lea.vmem %s155_s4, 128  ;;  %p657_p8 = scmp.lt.s32.totalorder %s155_s4, %s155_s4 }
  0x3e   : > { %p650_p1 = scmp.ne.s32.totalorder %s155_s4, %s649_s7  ;;  %p658_p2 = scmp.lt.s32.totalorder %s649_s7, %s649_s7 }
  0x40   : > { %p652_p4 = pnand %p650_p1, %p638_p9  ;;  %p659_p3 = por %p658_p2, %p657_p8 }
  0x42   : > { %p653_p13 = pneg %p652_p4 }
  0x44   : > { %p660_p6 = pnand %p659_p3, %p653_p13 }
  0x46   : > { %663 = shalt.err (!%p660_p6)
}
  0x47   : > { %536 = dma.hbm_to_vmem [thread:$0]  (!%p921_p5), %s1041_s0, 128, %s155_s4, [#allocation4]  }
  0x48   : > { %s664_s11 = scalar_lea.hbm %s928_s19, 16  ;;  %p1055_p9 = scmp.ne.s32.totalorder %s1051_s29, 0 }
  0x49   : > { %p665_p7 = scmp.ne.s32.totalorder %s928_s19, %s664_s11  ;;  %s669_s23 = scalar_lea.hbm %s1043_s2, 128 }
  0x4a   : > { %p1056_p11 = pneg %p1055_p9  ;;  %p670_p6 = scmp.lt.u32.totalorder %s928_s19, %s1043_s2 }
  0x4b   : > { %p671_p8 = scmp.lt.u32.totalorder %s669_s23, %s664_s11  ;;  %p673_p2 = scmp.lt.u32.totalorder %s664_s11, %s928_s19 }
  0x4c   : > { %p667_p12 = pnand %p665_p7, %p1056_p11 }
  0x4d   : > { %p672_p13 = por %p671_p8, %p670_p6 }
  0x4e   : > { %p668_p10 = pneg %p667_p12 }
  0x4f   : > { %p674_p3 = por %p673_p2, %p672_p13 }
  0x51   : > { %p675_p0 = pnand %p674_p3, %p668_p10 }
  0x53   : > { %678 = shalt.err (!%p675_p0)
}
  0x54   : > { %s679_s4 = scalar_lea.vmem %s930_s8, 16  ;;  %p1057_p1 = pmov %p1056_p11 }
  0x55   : > { %p680_p5 = scmp.ne.s32.totalorder %s930_s8, %s679_s4  ;;  %s784_s25 = smov [#allocation8]  }
  0x56   : > { %s684_s26 = sshll.u32 %s784_s25, 4  ;;  %s685_s26 = int_to_ptr.vmem [resolvable:$false] %s684_s26 }
  0x57   : > { %p682_p4 = pnand %p680_p5, %p1057_p1  ;;  %s686_s28 = scalar_lea.vmem %s685_s26, 32 }
  0x58   : > { %p687_p11 = scmp.lt.s32.totalorder %s930_s8, %s685_s26  ;;  %p688_p12 = scmp.lt.s32.totalorder %s686_s28, %s679_s4 }
  0x59   : > { %p683_p7 = pneg %p682_p4 }
  0x5a   : > { %p689_p6 = por %p688_p12, %p687_p11 }
  0x5c   : > { %p690_p8 = pnand %p689_p6, %p683_p7 }
  0x5e   : > { %693 = shalt.err (!%p690_p8)
}
  0x5f   : > { %543 = dma.hbm_to_vmem [thread:$0]  (!%p1055_p9), %s928_s19, 16, %s930_s8, %s868_s5  }
  0x60   : > { %p1058_p10 = scmp.ne.s32.totalorder %s1053_s6, 0 }
  0x61   : > { %p1059_p13 = scmp.eq.s32.totalorder (!%p1058_p10), %s897_s27, 0 }
  0x62   : > { %205 = sbr.rel (%p1058_p10) target bundleno = 549 (0x225), region = 32 }
  0x69   : > { %745 = dma.done.wait (%p1059_p13), [#allocation4], 128   ;;  %p1060_p2 = pmov %p1059_p13 }
  0x6a   : > { %s211_s7 = sand.u32 1, %s897_s27   ;;  %s213_s12 = sand.u32 1, %s762_s13  }
  0x6b   : > { %747 = vsyncadd (%p1060_p2), [#allocation4], 4294967168  ;;  %s484_s10 = sshll.u32 %s213_s12, 5  ;;  %s212_s29 = scalar_lea.sflag [#allocation7], %s211_s7 }
  0x6c   : > { %s980_s11 = scalar_lea.vmem [#allocation6], %s484_s10  ;;  %p1061_p3 = scmp.ne.s32.totalorder %s1052_s30, 0 }
  0x6e   : > { %749 = dma.done.wait (%p1061_p3), %s212_s29, 528  }
  0x6f   : > { %751 = vsyncadd (%p1061_p3), %s212_s29, 4294966768  ;;  %s986_s5 = scalar_lea.vmem [#allocation8], %s213_s12  ;;  %p485_p9 = scmp.ne.s32.totalorder %s770_s15, 0 }
  0x70   : > { %v249_v0 = vld [vmem:[#allocation3] sm:$0xff] (!%p485_p9)  ;;  %vm251_vm0 = vcmask (!%p485_p9), 261120  }
  0x71   : > { %248 = sbr.rel (%p485_p9) target bundleno = 276 (0x114), region = 48  ;;  %v250_v1 = vmul.f32 (!%p485_p9), %v249_v0, %v249_v0 }
  0x73   : > { %v252_v2 = vsel (!%p485_p9), %vm251_vm0, %v250_v1, 0.0 }
  0x74   : > { %253 = vadd.xlane.f32.xlu0 (!%p485_p9), %v252_v2 }
 0x101   : > { %v254_v3 = vpop.xlane.xlu0 %253 }
 0x102   : > { %v256_v4 = vmul.f32 0.03125, %v254_v3 }
 0x104   : > { %v257_v5 = vadd.f32 1e-08, %v256_v4 }
 0x106   : > { %604 = vrsqrt.f32 %v257_v5 }
 0x110   : > { %v605_v6 = vpop.eup %604 }
 0x111   : > { %v259_v7 = vmul.f32 %v605_v6, %v249_v0 }
 0x113   : > { %260 = vst.msk [vmem:[#allocation2] sm:$0xff] %vm251_vm0, %v259_v7 }
 0x114 PF: > { %v262_v8 = vld [vmem:[%s980_s11] sm:$0xff]  ;;  %v263_v9 = vld [vmem:[%s980_s11 + $0x8] sm:$0xff]  ;;  %vm266_vm1 = vcmask 261120   ;;  %v785_v10 = vmov 0.0|0.0   ;;  %vm786_vm3 = vmmov 0   ;;  %v787_v12 = vmov 0.0  }
 0x115   : > { %513 = vmatprep.subr.bf16.mxu0 %v785_v10  ;;  %v514_v11 = vpack.c.bf16 %v263_v9, %v262_v8  ;;  %vm515_vm2 = vmpackc.low %vm266_vm1, %vm266_vm1  ;;  %510 = vmatprep.mubr.msk.f32.mxu0 %vm786_vm3, %v787_v12  ;;  %v264_v13 = vld [vmem:[%s980_s11 + $0x10] sm:$0xff]  ;;  %v265_v14 = vld [vmem:[%s980_s11 + $0x18] sm:$0xff]  ;;  %v356_v17 = vlaneseq  ;;  %p491_p0 = scmp.ne.s32.totalorder %s770_s15, 7 }
 0x116   : > { %v518_v15 = vpack.c.bf16 %v265_v14, %v264_v13  ;;  %v353_v19 = vld [vmem:[%s986_s5] sm:$0x1] }
 0x117   : > { %516 = vmatpush3.bf16.xpose.msk.msra.mxu0 %vm515_vm2, %v514_v11  ;;  %v357_v18 = vshrl.u32 %v356_v17, 7  ;;  %v354_v20 = vmul.f32 0.01, %v353_v19 }
 0x118   : > { %517 = vmatprep.subr.bf16.mxu0 %v785_v10 }
 0x119   : > { %v358_v21 = vsub.s32 0, %v357_v18 }
 0x11a   : > { %v261_v16 = vld [vmem:[#allocation2] sm:$0xff] }
 0x11b   : > { %v359_v22 = vrot.slane %v354_v20, %v358_v21 }
 0x11f   : > { %520 = vmatpush3.bf16.xpose.msk.msra.mxu0 %vm515_vm2, %v518_v15 }
 0x126   : > { %511 = vmatmul.mubr.msk.f32.vlgmr.msra.gmra.mrb[0].mxu0 %vm266_vm1, %v261_v16 }
 0x1f9   : > { %v348_v23 = vpop.f32.mrb[0].mxu0 }
 0x1fa   : > { %v352_v24 = vmul.f32 0.0017677669, %v348_v23  ;;  %v512_v25 = vpop.f32.mrb[1].mxu0 }
 0x1fc   : > { %v361_v26 = vadd.f32 %v359_v22, %v352_v24 }
 0x1fd   : > { %370 = sbr.rel (%p491_p0) target bundleno = 524 (0x20c), region = 52 }
 0x1fe   : > { %vm362_vm4 = vcmp.ge.f32.partialorder %v361_v26, 0.0  ;;  %v363_v27 = vmul.f32 0.2, %v361_v26 }
 0x200   : > { %v364_v28 = vsel %vm362_vm4, %v361_v26, %v363_v27 }
 0x201   : > { %v365_v29 = vmul.f32 1.4142135, %v364_v28 }
 0x203   : > { %366 = vst.msk [vmem:[#allocation2] sm:$0xff] %vm266_vm1, %v365_v29 }
 0x20a   : > { %v371_v30 = vld [vmem:[#allocation2] sm:$0xff] }
 0x20b   : > { %372 = vst.msk [vmem:[#allocation9] sm:$0xff] %vm266_vm1, %v371_v30 }
 0x20c PF: > { %p547_p5 = scmp.eq.s32.totalorder %s897_s27, 7  ;;  %s788_s30 = smov [#allocation9]  }
 0x20d   : > { %s382_s6 = sshll.u32 %s788_s30, 4  ;;  %s383_s6 = int_to_ptr.vmem [resolvable:$true] %s382_s6 }
 0x20e   : > { %s694_s8 = scalar_lea.vmem %s383_s6, 128  ;;  %p701_p11 = scmp.lt.s32.totalorder %s383_s6, %s383_s6 }
 0x20f   : > { %p695_p1 = scmp.ne.s32.totalorder %s383_s6, %s694_s8  ;;  %p702_p12 = scmp.lt.s32.totalorder %s694_s8, %s694_s8 }
 0x211   : > { %p696_p4 = pnand %p695_p1, %p547_p5  ;;  %p703_p6 = por %p702_p12, %p701_p11 }
 0x213   : > { %p697_p7 = pneg %p696_p4 }
 0x215   : > { %p704_p8 = pnand %p703_p6, %p697_p7 }
 0x217   : > { %707 = shalt.err (!%p704_p8)
}
 0x218   : > { %s708_s20 = scalar_lea.hbm %s1044_s3, 128 }
 0x219   : > { %p709_p10 = scmp.ne.s32.totalorder %s1044_s3, %s708_s20  ;;  %p714_p3 = scmp.lt.u32.totalorder %s708_s20, %s1044_s3 }
 0x21b   : > { %p710_p13 = pnand %p709_p10, %p547_p5 }
 0x21d   : > { %p711_p2 = pneg %p710_p13 }
 0x21f   : > { %p716_p9 = pnand %p714_p3, %p711_p2 }
 0x221   : > { %719 = shalt.err (!%p716_p9)
}
 0x222   : > { %530 = dma.vmem_to_hbm [thread:$0]  (%p547_p5), %s383_s6, 128, %s1044_s3, [#allocation5]  }
 0x223   : > { %753 = dma.done.wait (%p547_p5), [#allocation5], 128  }
 0x224   : > { %755 = vsyncadd (%p547_p5), [#allocation5], 4294967168 }
 0x225 PF: > { %s18_s17 = sadd.s32 1, %s778_s17   ;;  %s1062_s12 = smov %s762_s13 }
 0x226   : > { %p15_p0 = scmp.ge.s32.totalorder %s18_s17, 10   ;;  %s1063_s13 = smov %s766_s14 }
 0x227   : > { %s1064_s14 = smov %s853_s24  ;;  %s1065_s15 = smov %s774_s16 }
 0x228   : > { %s1066_s16 = smov %s1068_s18  ;;  %17 = sbr.rel (!%p15_p0) target bundleno = 6 (0x6), region = 95 }
 0x22f   :  { %395 = vsyncpa [#allocation4], 1 }
 0x230   :  { %397 = vsyncpa [#allocation4 + $0x1], 1 }
 0x231   :  { %398 = vsyncpa [#allocation7], 1 }
 0x232   :  { %400 = vsyncpa [#allocation7 + $0x1], 1 }
 0x233   :  { %401 = vsyncpa [#allocation5], 1 }
 0x234   :  { %403 = vsyncpa [#allocation5 + $0x1], 1 }

</bundles_post_ra>
